<compile_context>
chip_gen: v7x
topology: tpu7x:2x2x1
jax: 0.10.0
libtpu: 0.0.40
codegen_flags: <defaults>
</compile_context>

<pallas_src>
import functools

import jax
import jax.numpy as jnp
from jax.experimental import pallas as pl
from jax.experimental.pallas import tpu as pltpu


# ----------------------------------------------------------------------------
# Kernel 1: fused QKV projection (wide matmul, scale pre-folded into Wq).
# ----------------------------------------------------------------------------
def _qkv_proj_kernel(x_ref, w_ref, o_ref):
    # x_ref: (1, TN, dim)   w_ref: (dim, 3*inner)   o_ref: (1, TN, 3*inner)
    o_ref[0] = jnp.dot(
        x_ref[0], w_ref[...], preferred_element_type=jnp.float32
    ).astype(o_ref.dtype)


# ----------------------------------------------------------------------------
# Kernel 2: flash-style attention with fused output projection + bias.
# ----------------------------------------------------------------------------
def _flash_attn_kernel(q_ref, k_ref, v_ref, wo_ref, b_ref, o_ref,
                       m_ref, l_ref, acc_ref, *, heads):
    # q_ref: (1, H, TQ, d)  k_ref/v_ref: (1, H, TKV, d)
    # wo_ref: (H, d, dim)   b_ref: (1, dim)   o_ref: (1, TQ, dim)
    # scratch: m_ref/l_ref (H, TQ, 1) f32, acc_ref (H, TQ, d) f32
    ki = pl.program_id(2)

    @pl.when(ki == 0)
    def _():
        m_ref[...] = jnp.full(m_ref.shape, -jnp.inf, jnp.float32)
        l_ref[...] = jnp.zeros(l_ref.shape, jnp.float32)
        acc_ref[...] = jnp.zeros(acc_ref.shape, jnp.float32)

    q = q_ref[0]                          # (H, TQ, d)  — input dtype (MXU-native)
    k = k_ref[0]                          # (H, TKV, d)
    v = v_ref[0]                          # (H, TKV, d)

    # Scores for all heads in one batched matmul; scale already folded into Wq.
    # Contraction over the last dim of both operands -> no explicit k.T.
    s = jnp.einsum("hqd,hkd->hqk", q, k,
                   preferred_element_type=jnp.float32)      # (H, TQ, TKV) f32

    # Online softmax (f32 statistics).
    m_prev = m_ref[...]
    m_new = jnp.maximum(m_prev, jnp.max(s, axis=-1, keepdims=True))
    alpha = jnp.exp(m_prev - m_new)                           # (H, TQ, 1)
    p = jnp.exp(s - m_new)                                    # (H, TQ, TKV)
    l_ref[...] = alpha * l_ref[...] + jnp.sum(p, axis=-1, keepdims=True)
    acc_ref[...] = alpha * acc_ref[...] + jnp.einsum(
        "hqk,hkd->hqd", p.astype(v.dtype), v,
        preferred_element_type=jnp.float32)                   # (H, TQ, d)
    m_ref[...] = m_new

    @pl.when(ki == pl.num_programs(2) - 1)
    def _():
        # Deferred normalization on the small (H, TQ, d) accumulator.
        inv_l = pl.reciprocal(l_ref[...], approx=True)        # EUP slot
        out = acc_ref[...] * inv_l                            # (H, TQ, d) f32

        tq = out.shape[1]
        dim_out = wo_ref.shape[-1]
        # Fused output projection: y = sum_h out[h] @ Wo[h] + b  (no concat,
        # no (TQ, inner) intermediate).  `heads` is small & static.
        y = jnp.zeros((tq, dim_out), jnp.float32)
        for h in range(heads):
            y = y + jnp.dot(out[h].astype(wo_ref.dtype), wo_ref[h],
                            preferred_element_type=jnp.float32)
        y = y + b_ref[...].astype(jnp.float32)                # broadcast (1, dim)
        o_ref[0] = y.astype(o_ref.dtype)


def _tile(n, target):
    t = min(n, target)
    return t if n % t == 0 else n


# ----------------------------------------------------------------------------
# Wrapper
# ----------------------------------------------------------------------------
def attention_pallas(x, w_qkv, w_out, b_out, *, heads, dim_head, scale,
                     q_tile=128, kv_tile=128, proj_tile=256):
    b, n, dim = x.shape
    inner = heads * dim_head
    assert w_qkv.shape == (dim, 3 * inner)
    assert w_out.shape == (inner, dim)
    assert b_out.shape == (dim,)

    # Fold the attention scale into the Q projection weights (zero runtime cost).
    w_qkv_scaled = w_qkv.at[:, :inner].multiply(scale)

    # --- Kernel 1: QKV projection ---------------------------------------
    tn = _tile(n, proj_tile)
    qkv = pl.pallas_call(
        _qkv_proj_kernel,
        out_shape=jax.ShapeDtypeStruct((b, n, 3 * inner), x.dtype),
        grid_spec=pltpu.PrefetchScalarGridSpec(
            num_scalar_prefetch=0,
            grid=(b, n // tn),
            in_specs=[
                pl.BlockSpec((1, tn, dim), lambda bi, ti: (bi, ti, 0)),
                pl.BlockSpec((dim, 3 * inner), lambda bi, ti: (0, 0)),
            ],
            out_specs=pl.BlockSpec((1, tn, 3 * inner), lambda bi, ti: (bi, ti, 0)),
        ),
        compiler_params=pltpu.CompilerParams(
            dimension_semantics=("parallel", "parallel")),
    )(x, w_qkv_scaled)

    # --- Wrapper-side layout plumbing (XLA): 'b n (h d) -> b h n d' -------
    q = qkv[..., 0 * inner:1 * inner]
    k = qkv[..., 1 * inner:2 * inner]
    v = qkv[..., 2 * inner:3 * inner]

    def to_heads(t):
        return t.reshape(b, n, heads, dim_head).transpose(0, 2, 1, 3)

    q_hm, k_hm, v_hm = to_heads(q), to_heads(k), to_heads(v)
    w_o_hm = w_out.reshape(heads, dim_head, dim)   # head-major output weights
    b_o = b_out.reshape(1, dim)

    # --- Kernel 2: flash attention + fused output projection --------------
    tq = _tile(n, q_tile)
    tkv = _tile(n, kv_tile)
    kernel = functools.partial(_flash_attn_kernel, heads=heads)

    out = pl.pallas_call(
        kernel,
        out_shape=jax.ShapeDtypeStruct((b, n, dim), x.dtype),
        grid_spec=pltpu.PrefetchScalarGridSpec(
            num_scalar_prefetch=0,
            grid=(b, n // tq, n // tkv),
            in_specs=[
                pl.BlockSpec((1, heads, tq, dim_head),
                             lambda bi, qi, ki: (bi, 0, qi, 0)),
                pl.BlockSpec((1, heads, tkv, dim_head),
                             lambda bi, qi, ki: (bi, 0, ki, 0)),
                pl.BlockSpec((1, heads, tkv, dim_head),
                             lambda bi, qi, ki: (bi, 0, ki, 0)),
                pl.BlockSpec((heads, dim_head, dim),
                             lambda bi, qi, ki: (0, 0, 0)),
                pl.BlockSpec((1, dim), lambda bi, qi, ki: (0, 0)),
            ],
            out_specs=pl.BlockSpec((1, tq, dim),
                                   lambda bi, qi, ki: (bi, qi, 0)),
            scratch_shapes=[
                pltpu.VMEM((heads, tq, 1), jnp.float32),        # running max
                pltpu.VMEM((heads, tq, 1), jnp.float32),        # running sum
                pltpu.VMEM((heads, tq, dim_head), jnp.float32),  # accumulator
            ],
        ),
        compiler_params=pltpu.CompilerParams(
            dimension_semantics=("parallel", "parallel", "arbitrary")),
    )(q_hm, k_hm, v_hm, w_o_hm, b_o)

    return out


# ----------------------------------------------------------------------------
# Pure-JAX reference mirroring the PyTorch forward.
# ----------------------------------------------------------------------------
def attention_ref(x, w_qkv, w_out, b_out, *, heads, dim_head, scale):
    b, n, dim = x.shape
    inner = heads * dim_head
    qkv = jnp.einsum("bnd,de->bne", x, w_qkv)
    q, k, v = jnp.split(qkv, 3, axis=-1)

    def to_heads(t):  # 'b n (h d) -> b h n d'
        return t.reshape(b, n, heads, dim_head).transpose(0, 2, 1, 3)

    q, k, v = map(to_heads, (q, k, v))
    dots = jnp.einsum("bhid,bhjd->bhij", q, k) * scale
    attn = jax.nn.softmax(dots, axis=-1)
    out = jnp.einsum("bhij,bhjd->bhid", attn, v)
    out = out.transpose(0, 2, 1, 3).reshape(b, n, inner)   # 'b h n d -> b n (h d)'
    return jnp.einsum("bne,ed->bnd", out, w_out) + b_out


if __name__ == "__main__":
    # Small shapes consistent with the module.
    batch, seq, dim = 2, 16, 32
    heads, dim_head = 4, 8
    inner_dim = heads * dim_head
    scale = dim ** (-0.5)   # NOTE: PyTorch module scales by dim**-0.5 (not dim_head)

    key = jax.random.PRNGKey(0)
    kx, kqkv, kout, kbias = jax.random.split(key, 4)

    x = jax.random.normal(kx, (batch, seq, dim), dtype=jnp.float32)
    # Deterministic weight init (uniform, à la nn.Linear default), stored as
    # (in_features, out_features) for x @ W.  to_qkv has bias=False in the
    # module; to_out's Linear has a bias by default.
    bound_qkv = 1.0 / (dim ** 0.5)
    bound_out = 1.0 / (inner_dim ** 0.5)
    w_qkv = jax.random.uniform(
        kqkv, (dim, 3 * inner_dim), minval=-bound_qkv, maxval=bound_qkv,
        dtype=jnp.float32)
    w_out = jax.random.uniform(
        kout, (inner_dim, dim), minval=-bound_out, maxval=bound_out,
        dtype=jnp.float32)
    b_out = jax.random.uniform(
        kbias, (dim,), minval=-bound_out, maxval=bound_out, dtype=jnp.float32)

    # Small tiles so the test exercises multiple q/kv grid steps and the
    # online-softmax accumulation path.
    attn_fn = jax.jit(functools.partial(
        attention_pallas, heads=heads, dim_head=dim_head, scale=scale,
        q_tile=8, kv_tile=8, proj_tile=8))

    y = attn_fn(x, w_qkv, w_out, b_out)
    y = jax.block_until_ready(y)

    y_ref = attention_ref(x, w_qkv, w_out, b_out, heads=heads,
                          dim_head=dim_head, scale=scale)
    assert y.shape == (batch, seq, dim)
    # Slightly loose tolerance: pl.reciprocal(approx=True) in the finalize.
    assert jnp.allclose(y, y_ref, atol=2e-3, rtol=2e-3), "mismatch vs reference"

    print("KERNEL_OK")
</pallas_src>

<mosaic_0001>
module attributes {stable_mosaic.version = 11 : i64} {
  func.func @_qkv_proj_kernel(%arg0: i32, %arg1: i32, %arg2: memref<1x8x32xf32, #tpu.memory_space<vmem>>, %arg3: memref<32x96xf32, #tpu.memory_space<vmem>>, %arg4: memref<1x8x96xf32, #tpu.memory_space<vmem>>) attributes {dimension_semantics = [#tpu.dimension_semantics<parallel>, #tpu.dimension_semantics<parallel>], iteration_bounds = array<i64: 2, 2>, scalar_prefetch = 0 : i64, scratch_operands = 0 : i64, tpu.core_type = #tpu.core_type<tc>, window_params = [{transform_indices = @transform_0, window_bounds = array<i64: 1, 8, 32>}, {pipeline_mode = #tpu.pipeline_mode<synchronous>, transform_indices = @transform_1, window_bounds = array<i64: 32, 96>}, {transform_indices = @transform_2, window_bounds = array<i64: 1, 8, 96>}]} {
    %c0 = arith.constant 0 : index
    %c0_0 = arith.constant 0 : index
    %c0_1 = arith.constant 0 : index
    %0 = vector.load %arg2[%c0, %c0_0, %c0_1] : memref<1x8x32xf32, #tpu.memory_space<vmem>>, vector<1x8x32xf32>
    %1 = vector.shape_cast %0 : vector<1x8x32xf32> to vector<8x32xf32>
    %c0_2 = arith.constant 0 : index
    %c0_3 = arith.constant 0 : index
    %2 = vector.load %arg3[%c0_2, %c0_3] : memref<32x96xf32, #tpu.memory_space<vmem>>, vector<32x96xf32>
    %cst = arith.constant dense<0.000000e+00> : vector<8x96xf32>
    %3 = tpu.matmul %1, %2, %cst {dimension_numbers = #tpu.dot_dimension_numbers<[1], [0], [0], [1], [0, 0, 1, 1], [], []>} : vector<8x32xf32>, vector<32x96xf32>, vector<8x96xf32> -> vector<8x96xf32>
    %c0_4 = arith.constant 0 : index
    %c0_5 = arith.constant 0 : index
    %c0_6 = arith.constant 0 : index
    %4 = vector.load %arg4[%c0_4, %c0_5, %c0_6] : memref<1x8x96xf32, #tpu.memory_space<vmem>>, vector<1x8x96xf32>
    %5 = vector.shape_cast %4 : vector<1x8x96xf32> to vector<8x96xf32>
    %6 = vector.shape_cast %3 : vector<8x96xf32> to vector<1x8x96xf32>
    tpu.vector_store %arg4[%c0_4, %c0_5, %c0_6], %6 {strides = array<i32>} : memref<1x8x96xf32, #tpu.memory_space<vmem>>, vector<1x8x96xf32>,
    return
  }
  func.func @transform_0(%arg0: i32, %arg1: i32) -> (i32, i32, i32) {
    %c0_i32 = arith.constant 0 : i32
    %c0_i32_0 = arith.constant 0 : i32
    return %arg0, %arg1, %c0_i32 : i32, i32, i32
  }
  func.func @transform_1(%arg0: i32, %arg1: i32) -> (i32, i32) {
    %c0_i32 = arith.constant 0 : i32
    %c0_i32_0 = arith.constant 0 : i32
    %c0_i32_1 = arith.constant 0 : i32
    return %c0_i32, %c0_i32_0 : i32, i32
  }
  func.func @transform_2(%arg0: i32, %arg1: i32) -> (i32, i32, i32) {
    %c0_i32 = arith.constant 0 : i32
    %c0_i32_0 = arith.constant 0 : i32
    return %arg0, %arg1, %c0_i32 : i32, i32, i32
  }
}

module attributes {stable_mosaic.version = 11 : i64} {
  func.func @_flash_attn_kernel(%arg0: i32, %arg1: i32, %arg2: i32, %arg3: memref<1x4x8x8xf32, #tpu.memory_space<vmem>>, %arg4: memref<1x4x8x8xf32, #tpu.memory_space<vmem>>, %arg5: memref<1x4x8x8xf32, #tpu.memory_space<vmem>>, %arg6: memref<4x8x32xf32, #tpu.memory_space<vmem>>, %arg7: memref<1x32xf32, #tpu.memory_space<vmem>>, %arg8: memref<1x8x32xf32, #tpu.memory_space<vmem>>, %arg9: memref<4x8x1xf32, #tpu.memory_space<vmem>>, %arg10: memref<4x8x1xf32, #tpu.memory_space<vmem>>, %arg11: memref<4x8x8xf32, #tpu.memory_space<vmem>>) attributes {dimension_semantics = [#tpu.dimension_semantics<parallel>, #tpu.dimension_semantics<parallel>, #tpu.dimension_semantics<arbitrary>], iteration_bounds = array<i64: 2, 2, 2>, scalar_prefetch = 0 : i64, scratch_operands = 3 : i64, tpu.core_type = #tpu.core_type<tc>, window_params = [{transform_indices = @transform_0, window_bounds = array<i64: 1, 4, 8, 8>}, {transform_indices = @transform_1, window_bounds = array<i64: 1, 4, 8, 8>}, {transform_indices = @transform_2, window_bounds = array<i64: 1, 4, 8, 8>}, {pipeline_mode = #tpu.pipeline_mode<synchronous>, transform_indices = @transform_3, window_bounds = array<i64: 4, 8, 32>}, {pipeline_mode = #tpu.pipeline_mode<synchronous>, transform_indices = @transform_4, window_bounds = array<i64: 1, 32>}, {transform_indices = @transform_5, window_bounds = array<i64: 1, 8, 32>}]} {
    %c0_i32 = arith.constant 0 : i32
    %0 = arith.cmpi eq, %arg2, %c0_i32 : i32
    %1 = arith.extui %0 : i1 to i32
    %c0_i32_0 = arith.constant 0 : i32
    %2 = arith.cmpi ne, %1, %c0_i32_0 : i32
    scf.if %2 {
      %cst_34 = arith.constant 0xFF800000 : f32
      %35 = vector.broadcast %cst_34 : f32 to vector<4x8x1xf32>
      %c0_35 = arith.constant 0 : index
      %c0_36 = arith.constant 0 : index
      %c0_37 = arith.constant 0 : index
      %36 = vector.load %arg9[%c0_35, %c0_36, %c0_37] : memref<4x8x1xf32, #tpu.memory_space<vmem>>, vector<4x8x1xf32>
      tpu.vector_store %arg9[%c0_35, %c0_36, %c0_37], %35 {strides = array<i32>} : memref<4x8x1xf32, #tpu.memory_space<vmem>>, vector<4x8x1xf32>,
      %cst_38 = arith.constant 0.000000e+00 : f32
      %37 = vector.broadcast %cst_38 : f32 to vector<4x8x1xf32>
      %c0_39 = arith.constant 0 : index
      %c0_40 = arith.constant 0 : index
      %c0_41 = arith.constant 0 : index
      %38 = vector.load %arg10[%c0_39, %c0_40, %c0_41] : memref<4x8x1xf32, #tpu.memory_space<vmem>>, vector<4x8x1xf32>
      tpu.vector_store %arg10[%c0_39, %c0_40, %c0_41], %37 {strides = array<i32>} : memref<4x8x1xf32, #tpu.memory_space<vmem>>, vector<4x8x1xf32>,
      %cst_42 = arith.constant 0.000000e+00 : f32
      %39 = vector.broadcast %cst_42 : f32 to vector<4x8x8xf32>
      %c0_43 = arith.constant 0 : index
      %c0_44 = arith.constant 0 : index
      %c0_45 = arith.constant 0 : index
      %40 = vector.load %arg11[%c0_43, %c0_44, %c0_45] : memref<4x8x8xf32, #tpu.memory_space<vmem>>, vector<4x8x8xf32>
      tpu.vector_store %arg11[%c0_43, %c0_44, %c0_45], %39 {strides = array<i32>} : memref<4x8x8xf32, #tpu.memory_space<vmem>>, vector<4x8x8xf32>,
    } else {
    }
    %c0 = arith.constant 0 : index
    %c0_1 = arith.constant 0 : index
    %c0_2 = arith.constant 0 : index
    %c0_3 = arith.constant 0 : index
    %3 = vector.load %arg3[%c0, %c0_1, %c0_2, %c0_3] : memref<1x4x8x8xf32, #tpu.memory_space<vmem>>, vector<1x4x8x8xf32>
    %4 = vector.shape_cast %3 : vector<1x4x8x8xf32> to vector<4x8x8xf32>
    %c0_4 = arith.constant 0 : index
    %c0_5 = arith.constant 0 : index
    %c0_6 = arith.constant 0 : index
    %c0_7 = arith.constant 0 : index
    %5 = vector.load %arg4[%c0_4, %c0_5, %c0_6, %c0_7] : memref<1x4x8x8xf32, #tpu.memory_space<vmem>>, vector<1x4x8x8xf32>
    %6 = vector.shape_cast %5 : vector<1x4x8x8xf32> to vector<4x8x8xf32>
    %c0_8 = arith.constant 0 : index
    %c0_9 = arith.constant 0 : index
    %c0_10 = arith.constant 0 : index
    %c0_11 = arith.constant 0 : index
    %7 = vector.load %arg5[%c0_8, %c0_9, %c0_10, %c0_11] : memref<1x4x8x8xf32, #tpu.memory_space<vmem>>, vector<1x4x8x8xf32>
    %8 = vector.shape_cast %7 : vector<1x4x8x8xf32> to vector<4x8x8xf32>
    "tpu.trace_start"() <{level = 10 : i32, message = "hqd,hkd->hqk"}> : () -> ()
    %cst = arith.constant dense<0.000000e+00> : vector<4x8x8xf32>
    %9 = tpu.matmul %4, %6, %cst {dimension_numbers = #tpu.dot_dimension_numbers<[2], [2], [1], [1], [0, 0, 0, 1, 1, 1], [0], [0]>} : vector<4x8x8xf32>, vector<4x8x8xf32>, vector<4x8x8xf32> -> vector<4x8x8xf32>
    "tpu.trace_stop"() : () -> ()
    %c0_12 = arith.constant 0 : index
    %c0_13 = arith.constant 0 : index
    %c0_14 = arith.constant 0 : index
    %10 = vector.load %arg9[%c0_12, %c0_13, %c0_14] : memref<4x8x1xf32, #tpu.memory_space<vmem>>, vector<4x8x1xf32>
    %cst_15 = arith.constant dense<0xFF800000> : vector<4x8xf32>
    %11 = vector.multi_reduction <maximumf>, %9, %cst_15 [2] : vector<4x8x8xf32> to vector<4x8xf32>
    %12 = vector.shape_cast %11 : vector<4x8xf32> to vector<4x8x1xf32>
    %13 = arith.maximumf %10, %12 : vector<4x8x1xf32>
    %14 = arith.subf %10, %13 : vector<4x8x1xf32>
    %15 = math.exp %14 : vector<4x8x1xf32>
    %16 = vector.broadcast %13 : vector<4x8x1xf32> to vector<4x8x8xf32>
    %17 = arith.subf %9, %16 : vector<4x8x8xf32>
    %18 = math.exp %17 : vector<4x8x8xf32>
    %c0_16 = arith.constant 0 : index
    %c0_17 = arith.constant 0 : index
    %c0_18 = arith.constant 0 : index
    %19 = vector.load %arg10[%c0_16, %c0_17, %c0_18] : memref<4x8x1xf32, #tpu.memory_space<vmem>>, vector<4x8x1xf32>
    %20 = arith.mulf %15, %19 : vector<4x8x1xf32>
    %cst_19 = arith.constant dense<0.000000e+00> : vector<4x8xf32>
    %21 = vector.multi_reduction <add>, %18, %cst_19 [2] : vector<4x8x8xf32> to vector<4x8xf32>
    %22 = vector.shape_cast %21 : vector<4x8xf32> to vector<4x8x1xf32>
    %23 = arith.addf %20, %22 : vector<4x8x1xf32>
    %c0_20 = arith.constant 0 : index
    %c0_21 = arith.constant 0 : index
    %c0_22 = arith.constant 0 : index
    %24 = vector.load %arg10[%c0_20, %c0_21, %c0_22] : memref<4x8x1xf32, #tpu.memory_space<vmem>>, vector<4x8x1xf32>
    tpu.vector_store %arg10[%c0_20, %c0_21, %c0_22], %23 {strides = array<i32>} : memref<4x8x1xf32, #tpu.memory_space<vmem>>, vector<4x8x1xf32>,
    %c0_23 = arith.constant 0 : index
    %c0_24 = arith.constant 0 : index
    %c0_25 = arith.constant 0 : index
    %25 = vector.load %arg11[%c0_23, %c0_24, %c0_25] : memref<4x8x8xf32, #tpu.memory_space<vmem>>, vector<4x8x8xf32>
    %26 = vector.broadcast %15 : vector<4x8x1xf32> to vector<4x8x8xf32>
    %27 = arith.mulf %26, %25 : vector<4x8x8xf32>
    "tpu.trace_start"() <{level = 10 : i32, message = "hqk,hkd->hqd"}> : () -> ()
    %cst_26 = arith.constant dense<0.000000e+00> : vector<4x8x8xf32>
    %28 = tpu.matmul %18, %8, %cst_26 {dimension_numbers = #tpu.dot_dimension_numbers<[2], [1], [1], [2], [0, 0, 0, 1, 1, 2], [0], [0]>} : vector<4x8x8xf32>, vector<4x8x8xf32>, vector<4x8x8xf32> -> vector<4x8x8xf32>
    "tpu.trace_stop"() : () -> ()
    %29 = arith.addf %27, %28 : vector<4x8x8xf32>
    %c0_27 = arith.constant 0 : index
    %c0_28 = arith.constant 0 : index
    %c0_29 = arith.constant 0 : index
    %30 = vector.load %arg11[%c0_27, %c0_28, %c0_29] : memref<4x8x8xf32, #tpu.memory_space<vmem>>, vector<4x8x8xf32>
    tpu.vector_store %arg11[%c0_27, %c0_28, %c0_29], %29 {strides = array<i32>} : memref<4x8x8xf32, #tpu.memory_space<vmem>>, vector<4x8x8xf32>,
    %c0_30 = arith.constant 0 : index
    %c0_31 = arith.constant 0 : index
    %c0_32 = arith.constant 0 : index
    %31 = vector.load %arg9[%c0_30, %c0_31, %c0_32] : memref<4x8x1xf32, #tpu.memory_space<vmem>>, vector<4x8x1xf32>
    tpu.vector_store %arg9[%c0_30, %c0_31, %c0_32], %13 {strides = array<i32>} : memref<4x8x1xf32, #tpu.memory_space<vmem>>, vector<4x8x1xf32>,
    %c1_i32 = arith.constant 1 : i32
    %32 = arith.cmpi eq, %arg2, %c1_i32 : i32
    %33 = arith.extui %32 : i1 to i32
    %c0_i32_33 = arith.constant 0 : i32
    %34 = arith.cmpi ne, %33, %c0_i32_33 : i32
    scf.if %34 {
      %c0_34 = arith.constant 0 : index
      %c0_35 = arith.constant 0 : index
      %c0_36 = arith.constant 0 : index
      %35 = vector.load %arg10[%c0_34, %c0_35, %c0_36] : memref<4x8x1xf32, #tpu.memory_space<vmem>>, vector<4x8x1xf32>
      %36 = tpu.reciprocal %35 {approx = true} : vector<4x8x1xf32> -> vector<4x8x1xf32>
      %c0_37 = arith.constant 0 : index
      %c0_38 = arith.constant 0 : index
      %c0_39 = arith.constant 0 : index
      %37 = vector.load %arg11[%c0_37, %c0_38, %c0_39] : memref<4x8x8xf32, #tpu.memory_space<vmem>>, vector<4x8x8xf32>
      %38 = vector.broadcast %36 : vector<4x8x1xf32> to vector<4x8x8xf32>
      %39 = arith.mulf %37, %38 : vector<4x8x8xf32>
      %cst_40 = arith.constant 0.000000e+00 : f32
      %40 = vector.broadcast %cst_40 : f32 to vector<8x32xf32>
      %41 = vector.extract_strided_slice %39 {offsets = [0, 0, 0], sizes = [1, 8, 8], strides = [1, 1, 1]} : vector<4x8x8xf32> to vector<1x8x8xf32>
      %42 = vector.shape_cast %41 : vector<1x8x8xf32> to vector<8x8xf32>
      %c0_41 = arith.constant 0 : index
      %c0_42 = arith.constant 0 : index
      %c0_43 = arith.constant 0 : index
      %43 = vector.load %arg6[%c0_41, %c0_42, %c0_43] : memref<4x8x32xf32, #tpu.memory_space<vmem>>, vector<1x8x32xf32>
      %44 = vector.shape_cast %43 : vector<1x8x32xf32> to vector<8x32xf32>
      %cst_44 = arith.constant dense<0.000000e+00> : vector<8x32xf32>
      %45 = tpu.matmul %42, %44, %cst_44 {dimension_numbers = #tpu.dot_dimension_numbers<[1], [0], [0], [1], [0, 0, 1, 1], [], []>} : vector<8x8xf32>, vector<8x32xf32>, vector<8x32xf32> -> vector<8x32xf32>
      %46 = arith.addf %40, %45 : vector<8x32xf32>
      %47 = vector.extract_strided_slice %39 {offsets = [1, 0, 0], sizes = [1, 8, 8], strides = [1, 1, 1]} : vector<4x8x8xf32> to vector<1x8x8xf32>
      %48 = vector.shape_cast %47 : vector<1x8x8xf32> to vector<8x8xf32>
      %c1 = arith.constant 1 : index
      %c0_45 = arith.constant 0 : index
      %c0_46 = arith.constant 0 : index
      %49 = vector.load %arg6[%c1, %c0_45, %c0_46] : memref<4x8x32xf32, #tpu.memory_space<vmem>>, vector<1x8x32xf32>
      %50 = vector.shape_cast %49 : vector<1x8x32xf32> to vector<8x32xf32>
      %cst_47 = arith.constant dense<0.000000e+00> : vector<8x32xf32>
      %51 = tpu.matmul %48, %50, %cst_47 {dimension_numbers = #tpu.dot_dimension_numbers<[1], [0], [0], [1], [0, 0, 1, 1], [], []>} : vector<8x8xf32>, vector<8x32xf32>, vector<8x32xf32> -> vector<8x32xf32>
      %52 = arith.addf %46, %51 : vector<8x32xf32>
      %53 = vector.extract_strided_slice %39 {offsets = [2, 0, 0], sizes = [1, 8, 8], strides = [1, 1, 1]} : vector<4x8x8xf32> to vector<1x8x8xf32>
      %54 = vector.shape_cast %53 : vector<1x8x8xf32> to vector<8x8xf32>
      %c2 = arith.constant 2 : index
      %c0_48 = arith.constant 0 : index
      %c0_49 = arith.constant 0 : index
      %55 = vector.load %arg6[%c2, %c0_48, %c0_49] : memref<4x8x32xf32, #tpu.memory_space<vmem>>, vector<1x8x32xf32>
      %56 = vector.shape_cast %55 : vector<1x8x32xf32> to vector<8x32xf32>
      %cst_50 = arith.constant dense<0.000000e+00> : vector<8x32xf32>
      %57 = tpu.matmul %54, %56, %cst_50 {dimension_numbers = #tpu.dot_dimension_numbers<[1], [0], [0], [1], [0, 0, 1, 1], [], []>} : vector<8x8xf32>, vector<8x32xf32>, vector<8x32xf32> -> vector<8x32xf32>
      %58 = arith.addf %52, %57 : vector<8x32xf32>
      %59 = vector.extract_strided_slice %39 {offsets = [3, 0, 0], sizes = [1, 8, 8], strides = [1, 1, 1]} : vector<4x8x8xf32> to vector<1x8x8xf32>
      %60 = vector.shape_cast %59 : vector<1x8x8xf32> to vector<8x8xf32>
      %c3 = arith.constant 3 : index
      %c0_51 = arith.constant 0 : index
      %c0_52 = arith.constant 0 : index
      %61 = vector.load %arg6[%c3, %c0_51, %c0_52] : memref<4x8x32xf32, #tpu.memory_space<vmem>>, vector<1x8x32xf32>
      %62 = vector.shape_cast %61 : vector<1x8x32xf32> to vector<8x32xf32>
      %cst_53 = arith.constant dense<0.000000e+00> : vector<8x32xf32>
      %63 = tpu.matmul %60, %62, %cst_53 {dimension_numbers = #tpu.dot_dimension_numbers<[1], [0], [0], [1], [0, 0, 1, 1], [], []>} : vector<8x8xf32>, vector<8x32xf32>, vector<8x32xf32> -> vector<8x32xf32>
      %64 = arith.addf %58, %63 : vector<8x32xf32>
      %c0_54 = arith.constant 0 : index
      %c0_55 = arith.constant 0 : index
      %65 = vector.load %arg7[%c0_54, %c0_55] : memref<1x32xf32, #tpu.memory_space<vmem>>, vector<1x32xf32>
      %66 = vector.broadcast %65 : vector<1x32xf32> to vector<8x32xf32>
      %67 = arith.addf %64, %66 : vector<8x32xf32>
      %c0_56 = arith.constant 0 : index
      %c0_57 = arith.constant 0 : index
      %c0_58 = arith.constant 0 : index
      %68 = vector.load %arg8[%c0_56, %c0_57, %c0_58] : memref<1x8x32xf32, #tpu.memory_space<vmem>>, vector<1x8x32xf32>
      %69 = vector.shape_cast %68 : vector<1x8x32xf32> to vector<8x32xf32>
      %70 = vector.shape_cast %67 : vector<8x32xf32> to vector<1x8x32xf32>
      tpu.vector_store %arg8[%c0_56, %c0_57, %c0_58], %70 {strides = array<i32>} : memref<1x8x32xf32, #tpu.memory_space<vmem>>, vector<1x8x32xf32>,
    } else {
    }
    return
  }
  func.func @transform_0(%arg0: i32, %arg1: i32, %arg2: i32) -> (i32, i32, i32, i32) {
    %c0_i32 = arith.constant 0 : i32
    %c0_i32_0 = arith.constant 0 : i32
    %c0_i32_1 = arith.constant 0 : i32
    return %arg0, %c0_i32, %arg1, %c0_i32_0 : i32, i32, i32, i32
  }
  func.func @transform_1(%arg0: i32, %arg1: i32, %arg2: i32) -> (i32, i32, i32, i32) {
    %c0_i32 = arith.constant 0 : i32
    %c0_i32_0 = arith.constant 0 : i32
    %c0_i32_1 = arith.constant 0 : i32
    return %arg0, %c0_i32, %arg2, %c0_i32_0 : i32, i32, i32, i32
  }
  func.func @transform_2(%arg0: i32, %arg1: i32, %arg2: i32) -> (i32, i32, i32, i32) {
    %c0_i32 = arith.constant 0 : i32
    %c0_i32_0 = arith.constant 0 : i32
    %c0_i32_1 = arith.constant 0 : i32
    return %arg0, %c0_i32, %arg2, %c0_i32_0 : i32, i32, i32, i32
  }
  func.func @transform_3(%arg0: i32, %arg1: i32, %arg2: i32) -> (i32, i32, i32) {
    %c0_i32 = arith.constant 0 : i32
    %c0_i32_0 = arith.constant 0 : i32
    %c0_i32_1 = arith.constant 0 : i32
    %c0_i32_2 = arith.constant 0 : i32
    return %c0_i32, %c0_i32_0, %c0_i32_1 : i32, i32, i32
  }
  func.func @transform_4(%arg0: i32, %arg1: i32, %arg2: i32) -> (i32, i32) {
    %c0_i32 = arith.constant 0 : i32
    %c0_i32_0 = arith.constant 0 : i32
    %c0_i32_1 = arith.constant 0 : i32
    return %c0_i32, %c0_i32_0 : i32, i32
  }
  func.func @transform_5(%arg0: i32, %arg1: i32, %arg2: i32) -> (i32, i32, i32) {
    %c0_i32 = arith.constant 0 : i32
    %c0_i32_0 = arith.constant 0 : i32
    return %arg0, %arg1, %c0_i32 : i32, i32, i32
  }
}

</mosaic_0001>

<bundles_post_ra>
// kernel: attention_pallas.2
= control target key start
LH: loop header
LB: loop body
LE: loop exit
PB: predicated region body
PF: predicated region fallthrough
CT: control target
= control target key end

     0   :  { %s477_s9 = smov 0   ;;  %s479_s10 = smov 0   ;;  %s544_s0 = inlined_call_operand.vmem [shape: f32[2,16,32], index: 0, kind: input, shape index: {}]   ;;  %s545_s1 = inlined_call_operand.vmem [shape: f32[32,96], index: 1, kind: input, shape index: {}]   ;;  %s546_s2 = inlined_call_operand.vmem [shape: f32[2,16,96], index: 2, kind: output, shape index: {}]  }
   0x1   :  { %s481_s11 = smov 0   ;;  %s483_s12 = smov 0  }
   0x2   :  { %s485_s13 = smov 0  }
   0x3 LB: > { %s21_s14 = sadd.s32 1, %s449_s11  ;;  %s24_s15 = sadd.s32 1, %s453_s12  ;;  %s457_s13 = sphi %s485_s13, %s12_s13   ;;  %s453_s12 = sphi %s483_s12, %s550_s12   ;;  %s449_s11 = sphi %s481_s11, %s549_s11   ;;  %s445_s10 = sphi %s479_s10, %s548_s10   ;;  %s441_s9 = sphi %s477_s9, %s547_s9  }
   0x4   : > { %p22_p0 = scmp.ge.s32.totalorder %s21_s14, 2  ;;  %p346_p1 = scmp.ge.s32.totalorder %s457_s13, 1 }
   0x5   : > { %p131_p2 = scmp.lt.s32.totalorder %s457_s13, 5 }
   0x6   : > { %s552_s14 = smov (%p22_p0, %s21_s14), 0  ;;  %s554_s15 = smov (!%p22_p0, %s24_s15), %s453_s12 }
   0x7   : > { %p132_p3 = pnand %p346_p1, %p131_p2  ;;  %p26_p4 = scmp.ge.s32.totalorder %s554_s15, 2 }
   0x8   : > { %v176_v0 = vld [vmem:[%s545_s1] sm:$0xff] (!%p132_p3)  ;;  %v177_v1 = vld [vmem:[%s545_s1 + $0x8] sm:$0xff] (!%p132_p3)  ;;  %v178_v2 = vld [vmem:[%s545_s1 + $0x10] sm:$0xff] (!%p132_p3)  ;;  %v459_v3 = vmov (!%p132_p3), 0.0|0.0   ;;  %vm460_vm0 = vmmov (!%p132_p3), 0   ;;  %v461_v6 = vmov (!%p132_p3), 0.0  }
   0x9   : > { %s556_s15 = smov (%p26_p4, %s554_s15), 0  ;;  %135 = sbr.rel (%p132_p3) target bundleno = 235 (0xeb), region = 28 }
   0xa   : > { %370 = vmatprep.subr.bf16.mxu0 (!%p132_p3), %v459_v3  ;;  %v371_v4 = vpack.c.bf16 (!%p132_p3), %v177_v1, %v176_v0  ;;  %v179_v5 = vld [vmem:[%s545_s1 + $0x18] sm:$0xff] (!%p132_p3)  ;;  %367 = vmatprep.mubr.msk.f32.mxu0 (!%p132_p3), %vm460_vm0, %v461_v6  ;;  %p159_p5 = scmp.lt.s32.totalorder (!%p132_p3), %s445_s10, 1  ;;  %p161_p6 = scmp.lt.s32.totalorder (!%p132_p3), %s441_s9, 1  ;;  %vm180_vm1 = vcmask (!%p132_p3), 261120   ;;  %vm254_vm2 = vcmask (!%p132_p3), 785408  }
   0xb   : > { %v374_v7 = vpack.c.bf16 (!%p132_p3), %v179_v5, %v178_v2 }
   0xc   : > { %372 = vmatpush3.bf16.msra.mxu0 (!%p132_p3), %v371_v4 }
   0xd   : > { %373 = vmatprep.subr.bf16.mxu0 (!%p132_p3), %v459_v3 }
  0x10   : > { %s558_s10 = smov (!%p159_p5, %s445_s10), 1  ;;  %s560_s9 = smov (!%p161_p6, %s441_s9), 1  ;;  %375 = vmatpush3.bf16.msra.mxu0 %v374_v7 }
  0x11   : > { %s347_s24 = sshll.u32 %s558_s10, 1 }
  0x12   : > { %s164_s25 = sadd.s32 %s347_s24, %s560_s9 }
  0x13   : > { %s348_s26 = sshll.u32 %s164_s25, 3 }
  0x14   : > { %s166_s29 = scalar_lea.vmem %s544_s0, %s348_s26  ;;  %s174_s4 = scalar_lea.vmem %s546_s2, %s348_s26 }
  0x15   : > { %v175_v8 = vld [vmem:[%s166_s29] sm:$0xff] }
  0x16   : > { %368 = vmatmul.mubr.msk.f32.vlgmr.msra.gmra.mrb[0].mxu0 %vm180_vm1, %v175_v8 }
  0xe9   : > { %v250_v9 = vpop.f32.mrb[0].mxu0 }
  0xea   : > { %255 = vst.msk [vmem:[%s174_s4] sm:$0xff] %vm254_vm2, %v250_v9  ;;  %v369_v10 = vpop.f32.mrb[1].mxu0 }
  0xeb PF: > { %s12_s13 = sadd.s32 1, %s457_s13   ;;  %s547_s9 = smov %s449_s11 }
  0xec   : > { %p9_p7 = scmp.ge.s32.totalorder %s12_s13, 6   ;;  %s548_s10 = smov %s453_s12 }
  0xed   : > { %s549_s11 = smov %s552_s14  ;;  %s550_s12 = smov %s556_s15 }
  0xee   :  { %11 = sbr.rel (!%p9_p7) target bundleno = 3 (0x3), region = 58 }

// kernel: attention_pallas.3
= control target key start
LH: loop header
LB: loop body
LE: loop exit
PB: predicated region body
PF: predicated region fallthrough
CT: control target
= control target key end

     0   :  { %s2446_s0 = inlined_call_operand.vmem [shape: f32[2,4,16,8], index: 0, kind: input, shape index: {}]   ;;  %s2447_s1 = inlined_call_operand.vmem [shape: f32[2,4,16,8], index: 1, kind: input, shape index: {}]   ;;  %s2448_s2 = inlined_call_operand.vmem [shape: f32[2,4,16,8], index: 2, kind: input, shape index: {}]   ;;  %s2449_s3 = inlined_call_operand.vmem [shape: f32[4,8,32], index: 3, kind: input, shape index: {}]   ;;  %s2450_s4 = inlined_call_operand.vmem [shape: f32[1,32], index: 4, kind: input, shape index: {}]   ;;  %s2451_s5 = inlined_call_operand.hbm [shape: f32[2,16,32], index: 5, kind: output, shape index: {}]  }
   0x1   :  { %2458 = sst [smem:[#allocation16_spill]] %s2451_s5 }
   0x2   :  { %10 = vsyncpa [#allocation9], 0 }
   0x3   :  { %12 = vsyncpa [#allocation9 + $0x1], 0  ;;  %s2122_s18 = smov 0   ;;  %s2124_s19 = smov 0  }
   0x4   :  { %s2126_s20 = smov 0   ;;  %s2128_s21 = smov 0  }
   0x5   :  { %s2130_s22 = smov 0   ;;  %s2132_s23 = smov 0  }
   0x6   :  { %s2134_s24 = smov 0   ;;  %s2136_s25 = smov 0  }
   0x7   :  { %s2138_s26 = smov 0   ;;  %s2140_s27 = smov 0  }
   0x8   :  { %s2142_s28 = smov 0   ;;  %s2144_s29 = smov 0  }
   0x9 LB: > { %2459 = sst [smem:[#allocation11_spill]] %s2037_s18  ;;  %s1687_s30 = sadd.s32 4294967295, %s2081_s29   ;;  %s2081_s29 = sphi %s2144_s29, %s18_s29   ;;  %s2077_s28 = sphi %s2142_s28, %s2484_s28   ;;  %s2073_s27 = sphi %s2140_s27, %s2483_s27   ;;  %s2069_s26 = sphi %s2138_s26, %s2482_s26   ;;  %s2065_s25 = sphi %s2136_s25, %s2481_s25   ;;  %s2061_s24 = sphi %s2134_s24, %s2480_s24   ;;  %s2057_s23 = sphi %s2132_s23, %s2479_s23   ;;  %s2053_s22 = sphi %s2130_s22, %s2478_s22   ;;  %s2049_s21 = sphi %s2128_s21, %s2477_s21   ;;  %s2045_s20 = sphi %s2126_s20, %s2476_s20   ;;  %s2041_s19 = sphi %s2124_s19, %s2475_s19   ;;  %s2037_s18 = sphi %s2122_s18, %s2474_s18  }
   0xa   : > { %s1688_s6 = sadd.s32 4294967294, %s2081_s29   ;;  %s30_s7 = sadd.s32 1, %s2069_s26 }
   0xb   : > { %p31_p0 = scmp.ge.s32.totalorder %s30_s7, 2  ;;  %s33_s8 = sadd.s32 1, %s2073_s27 }
   0xc   : > { %s37_s9 = sadd.s32 1, %s2077_s28  ;;  %p53_p1 = scmp.ne.s32.totalorder %s2053_s22, %s2049_s21 }
   0xd   : > { %s2486_s7 = smov (%p31_p0, %s30_s7), 0  ;;  %s2488_s8 = smov (!%p31_p0, %s33_s8), %s2073_s27 }
   0xe   : > { %2460 = sst [smem:[#allocation12_spill]] %s2486_s7  ;;  %s46_s10 = sadd.s32 1, %s2053_s22 }
   0xf   : > { %p54_p2 = scmp.eq.s32.totalorder %s2081_s29, 0  ;;  %p35_p3 = scmp.ge.s32.totalorder %s2488_s8, 2 }
  0x10   : > { %s70_s11 = ssub.s32 %s2069_s26, %s2486_s7  ;;  %p81_p5 = scmp.ne.s32.totalorder %s2045_s20, %s2041_s19 }
  0x11   : > { %p2199_p4 = por %p54_p2, %p53_p1  ;;  %s2490_s8 = smov (%p35_p3, %s2488_s8), 0 }
  0x12   : > { %2462 = sst [smem:[#allocation13_spill]] %s2490_s8  ;;  %s2492_s9 = smov (!%p35_p3, %s37_s9), %s2077_s28 }
  0x13   : > { %s42_s13 = ssub.s32 %s2073_s27, %s2490_s8  ;;  %p2210_p6 = por %p81_p5, %p54_p2 }
  0x14   : > { %p39_p7 = scmp.ge.s32.totalorder %s2492_s9, 2  ;;  %p183_p8 = scmp.eq.s32.totalorder %s1687_s30, 7 }
  0x15   : > { %p188_p9 = scmp.ne.s32.totalorder %s2049_s21, %s2037_s18  ;;  %p189_p10 = scmp.eq.s32.totalorder %s1688_s6, 7 }
  0x16   : > { %s2494_s9 = smov (%p39_p7, %s2492_s9), 0  ;;  %p2221_p11 = por %p183_p8, %p53_p1 }
  0x17   : > { %2464 = sst [smem:[#allocation14_spill]] %s2494_s9  ;;  %p2225_p12 = por %p189_p10, %p188_p9 }
  0x18   : > { %s41_s17 = ssub.s32 %s2077_s28, %s2494_s9  ;;  %s74_s8 = sadd.s32 1, %s2045_s20 }
  0x19   : > { %s2466_s16 = scalar_select %p2225_p12, 1, 0 }
  0x1a   : > { %s43_s7 = sor.u32 %s42_s13, %s41_s17  ;;  %s71_s5 = sor.u32 %s70_s11, %s41_s17 }
  0x1b   : > { %2467 = sst [smem:[#allocation15_spill]] %s2466_s16  ;;  %p44_p13 = scmp.eq.s32.totalorder %s43_s7, 0 }
  0x1c   : > { %p72_p0 = scmp.eq.s32.totalorder %s71_s5, 0  ;;  %p1690_p2 = scmp.ge.s32.totalorder %s2081_s29, 8 }
  0x1d   : > { %s2233_s30 = scalar_select %p44_p13, %s2053_s22, %s46_s10  }
  0x1e   : > { %s2236_s6 = scalar_select %p72_p0, %s2045_s20, %s74_s8  }
  0x1f   : > { %211 = sbr.rel (%p1690_p2) target bundleno = 62 (0x3e), region = 24 }
  0x26   : > { %214 = sbr.rel (!%p2199_p4) target bundleno = 46 (0x2e), region = 28  ;;  %s216_s16 = sand.u32 (%p2199_p4), 1, %s2053_s22  }
  0x27   : > { %s1692_s9 = sshll.u32 (%p2199_p4), %s2077_s28, 3  ;;  %s1691_s18 = sshll.u32 (%p2199_p4), %s216_s16, 5 }
  0x28   : > { %s220_s13 = sadd.s32 (%p2199_p4), %s2073_s27, %s1692_s9  ;;  %s218_s8 = scalar_lea.vmem (%p2199_p4), [#allocation5], %s1691_s18 }
  0x29   : > { %s1693_s11 = sshll.u32 (%p2199_p4), %s220_s13, 3 }
  0x2a   : > { %s222_s10 = scalar_lea.vmem (%p2199_p4), %s2446_s0, %s1693_s11 }
  0x2b   : > { %v256_v0 = vld [vmem:[%s222_s10] sm:$0xff] (%p2199_p4)  ;;  %v258_v1 = vld [vmem:[%s222_s10 + $0x10] sm:$0xff] (%p2199_p4) }
  0x2c   : > { %v260_v2 = vld [vmem:[%s222_s10 + $0x20] sm:$0xff] (%p2199_p4)  ;;  %257 = vst [vmem:[%s218_s8] sm:$0xff] (%p2199_p4), %v256_v0  ;;  %259 = vst [vmem:[%s218_s8 + $0x8] sm:$0xff] (%p2199_p4), %v258_v1  ;;  %v262_v3 = vld [vmem:[%s222_s10 + $0x30] sm:$0xff] (%p2199_p4) }
  0x2d   : > { %261 = vst [vmem:[%s218_s8 + $0x10] sm:$0xff] %v260_v2  ;;  %263 = vst [vmem:[%s218_s8 + $0x18] sm:$0xff] %v262_v3 }
  0x2e PF: > { %269 = sbr.rel (!%p2210_p6) target bundleno = 54 (0x36), region = 66  ;;  %s271_s9 = sand.u32 (%p2210_p6), 1, %s2045_s20  }
  0x2f   : > { %s1695_s12 = sshll.u32 (%p2210_p6), %s2077_s28, 3  ;;  %s1694_s16 = sshll.u32 (%p2210_p6), %s271_s9, 5 }
  0x30   : > { %s275_s17 = sadd.s32 (%p2210_p6), %s2069_s26, %s1695_s12  ;;  %s273_s5 = scalar_lea.vmem (%p2210_p6), [#allocation6], %s1694_s16 }
  0x31   : > { %s1696_s13 = sshll.u32 (%p2210_p6), %s275_s17, 3 }
  0x32   : > { %s277_s18 = scalar_lea.vmem (%p2210_p6), %s2447_s1, %s1696_s13 }
  0x33   : > { %v311_v4 = vld [vmem:[%s277_s18] sm:$0xff] (%p2210_p6)  ;;  %v313_v5 = vld [vmem:[%s277_s18 + $0x10] sm:$0xff] (%p2210_p6) }
  0x34   : > { %v315_v6 = vld [vmem:[%s277_s18 + $0x20] sm:$0xff] (%p2210_p6)  ;;  %312 = vst [vmem:[%s273_s5] sm:$0xff] (%p2210_p6), %v311_v4  ;;  %314 = vst [vmem:[%s273_s5 + $0x8] sm:$0xff] (%p2210_p6), %v313_v5  ;;  %v317_v7 = vld [vmem:[%s277_s18 + $0x30] sm:$0xff] (%p2210_p6) }
  0x35   : > { %316 = vst [vmem:[%s273_s5 + $0x10] sm:$0xff] %v315_v6  ;;  %318 = vst [vmem:[%s273_s5 + $0x18] sm:$0xff] %v317_v7 }
  0x36 PF: > { %324 = sbr.rel (!%p2210_p6) target bundleno = 62 (0x3e), region = 104  ;;  %s326_s10 = sand.u32 (%p2210_p6), 1, %s2045_s20  }
  0x37   : > { %s1698_s8 = sshll.u32 (%p2210_p6), %s2077_s28, 3  ;;  %s1697_s9 = sshll.u32 (%p2210_p6), %s326_s10, 5 }
  0x38   : > { %s330_s12 = sadd.s32 (%p2210_p6), %s2069_s26, %s1698_s8  ;;  %s328_s7 = scalar_lea.vmem (%p2210_p6), [#allocation7], %s1697_s9 }
  0x39   : > { %s1699_s17 = sshll.u32 (%p2210_p6), %s330_s12, 3 }
  0x3a   : > { %s332_s16 = scalar_lea.vmem (%p2210_p6), %s2448_s2, %s1699_s17 }
  0x3b   : > { %v366_v8 = vld [vmem:[%s332_s16] sm:$0xff] (%p2210_p6)  ;;  %v368_v9 = vld [vmem:[%s332_s16 + $0x10] sm:$0xff] (%p2210_p6) }
  0x3c   : > { %v370_v10 = vld [vmem:[%s332_s16 + $0x20] sm:$0xff] (%p2210_p6)  ;;  %367 = vst [vmem:[%s328_s7] sm:$0xff] (%p2210_p6), %v366_v8  ;;  %369 = vst [vmem:[%s328_s7 + $0x8] sm:$0xff] (%p2210_p6), %v368_v9  ;;  %v372_v11 = vld [vmem:[%s332_s16 + $0x30] sm:$0xff] (%p2210_p6) }
  0x3d   : > { %371 = vst [vmem:[%s328_s7 + $0x10] sm:$0xff] %v370_v10  ;;  %373 = vst [vmem:[%s328_s7 + $0x18] sm:$0xff] %v372_v11 }
  0x3e PF: > { %p1700_p1 = scmp.ge.s32.totalorder %s2081_s29, 1  ;;  %p378_p3 = scmp.lt.s32.totalorder %s2081_s29, 9 }
  0x40   : > { %p379_p4 = pnand %p1700_p1, %p378_p3 }
  0x41   : > { %s2266_s14 = sand.u32 (!%p379_p4), 1, %s2049_s21   ;;  %s392_s18 = sand.u32 (!%p379_p4), 1, %s2041_s19  }
  0x42   : > { %382 = sbr.rel (%p379_p4) target bundleno = 1183 (0x49f), region = 142  ;;  %s1701_s5 = sshll.u32 (!%p379_p4), %s2266_s14, 5 }
  0x43   : > { %s1702_s10 = sshll.u32 (!%p379_p4), %s392_s18, 5  ;;  %s1704_s8 = sshll.u32 (!%p379_p4), %s2266_s14, 3 }
  0x44   : > { %s2271_s9 = scalar_lea.vmem (!%p379_p4), [#allocation5], %s1701_s5  ;;  %s2273_s12 = scalar_lea.vmem (!%p379_p4), [#allocation6], %s1702_s10 }
  0x45   : > { %s2275_s17 = scalar_lea.vmem (!%p379_p4), [#allocation7], %s1702_s10  ;;  %s2277_s13 = scalar_lea.vmem (!%p379_p4), [#allocation8], %s1704_s8 }
  0x46   : > { %p1705_p5 = scmp.ne.s32.totalorder (!%p379_p4), %s2057_s23, 0 }
  0x49   : > { %437 = sbr.rel (%p1705_p5) target bundleno = 80 (0x50), region = 158  ;;  %vm438_vm0 = vcmask (!%p1705_p5), 7168   ;;  %vm447_vm1 = vcmask (!%p1705_p5), 64512   ;;  %v2083_v12 = vmov (!%p1705_p5), -inf   ;;  %v2084_v13 = vmov (!%p1705_p5), 0.0  }
  0x4a   : > { %439 = vst.msk [vmem:[#allocation2] sm:$0xff] (!%p1705_p5), %vm438_vm0, %v2083_v12  ;;  %440 = vst.msk [vmem:[#allocation2 + $0x8] sm:$0xff] (!%p1705_p5), %vm438_vm0, %v2083_v12 }
  0x4b   : > { %441 = vst.msk [vmem:[#allocation2 + $0x10] sm:$0xff] (!%p1705_p5), %vm438_vm0, %v2083_v12  ;;  %442 = vst.msk [vmem:[#allocation2 + $0x18] sm:$0xff] (!%p1705_p5), %vm438_vm0, %v2083_v12 }
  0x4c   : > { %443 = vst.msk [vmem:[#allocation3] sm:$0xff] (!%p1705_p5), %vm438_vm0, %v2084_v13  ;;  %444 = vst.msk [vmem:[#allocation3 + $0x8] sm:$0xff] (!%p1705_p5), %vm438_vm0, %v2084_v13 }
  0x4d   : > { %445 = vst.msk [vmem:[#allocation3 + $0x10] sm:$0xff] (!%p1705_p5), %vm438_vm0, %v2084_v13  ;;  %446 = vst.msk [vmem:[#allocation3 + $0x18] sm:$0xff] (!%p1705_p5), %vm438_vm0, %v2084_v13 }
  0x4e   : > { %448 = vst.msk [vmem:[#allocation4] sm:$0xff] (!%p1705_p5), %vm447_vm1, %v2084_v13  ;;  %449 = vst.msk [vmem:[#allocation4 + $0x8] sm:$0xff] (!%p1705_p5), %vm447_vm1, %v2084_v13 }
  0x4f   : > { %450 = vst.msk [vmem:[#allocation4 + $0x10] sm:$0xff] (!%p1705_p5), %vm447_vm1, %v2084_v13  ;;  %451 = vst.msk [vmem:[#allocation4 + $0x18] sm:$0xff] (!%p1705_p5), %vm447_vm1, %v2084_v13 }
  0x50 PF: > { %v456_v14 = vld [vmem:[%s2273_s12] sm:$0xff]  ;;  %vm464_vm2 = vcmask 64512   ;;  %v457_v15 = vld [vmem:[%s2273_s12 + $0x8] sm:$0xff]  ;;  %v2085_v16 = vmov 0.0   ;;  %vm2086_vm3 = vmmov 0   ;;  %v458_v19 = vld [vmem:[%s2273_s12 + $0x10] sm:$0xff] }
  0x51   : > { %1756 = vmatprep.subr.mxu0 %v2085_v16  ;;  %1758 = vmatprep.mubr.msk.f32.mxu0 %vm2086_vm3, %v2085_v16  ;;  %v452_v17 = vld [vmem:[%s2271_s9] sm:$0xff]  ;;  %v453_v18 = vld [vmem:[%s2271_s9 + $0x8] sm:$0xff]  ;;  %v459_v20 = vld [vmem:[%s2273_s12 + $0x18] sm:$0xff]  ;;  %v2087_v35 = vmov 0   ;;  %vm857_vm4 = vcmask 7168   ;;  %p1718_p6 = scmp.ne.s32.totalorder %s2057_s23, 1 }
  0x52   : > { %1757 = vmatpush3.xpose.msk.msra.mxu0 %vm464_vm2, %v456_v14  ;;  %1761 = vmatprep.subr.mxu1 %v2085_v16  ;;  %v454_v21 = vld [vmem:[%s2271_s9 + $0x10] sm:$0xff]  ;;  %v455_v22 = vld [vmem:[%s2271_s9 + $0x18] sm:$0xff]  ;;  %v769_v36 = vld [vmem:[#allocation2] sm:$0xff]  ;;  %vm2090_vm5 = vmmov (!%p1718_p6), 0   ;;  %vm1543_vm6 = vcmask (!%p1718_p6), 261120  }
  0x53   : > { %1762 = vmatpush3.xpose.msk.msra.mxu1 %vm464_vm2, %v457_v15  ;;  %1763 = vmatprep.mubr.msk.f32.mxu1 %vm2086_vm3, %v2085_v16  ;;  %v2318_v39 = vld [vmem:[#allocation2 + $0x8] sm:$0xff]  ;;  %v771_v40 = vld [vmem:[#allocation2 + $0x10] sm:$0xff]  ;;  %v2322_v47 = vld [vmem:[#allocation2 + $0x18] sm:$0xff] }
  0x54   : > { %1766 = vmatprep.subr.mxu0 %v2085_v16  ;;  %1771 = vmatprep.subr.mxu1 %v2085_v16  ;;  %v460_v53 = vld [vmem:[%s2275_s17] sm:$0xff]  ;;  %v461_v55 = vld [vmem:[%s2275_s17 + $0x8] sm:$0xff]  ;;  %v462_v3 = vld [vmem:[%s2275_s17 + $0x10] sm:$0xff] }
  0x55   : > { %1759 = vmatmul.mubr.msk.f32.vlgmr.msra.gmra.mrb[0].mxu0 %vm464_vm2, %v452_v17  ;;  %1927 = vset.pattern.permute.xlu0 %v2087_v35  ;;  %v463_v7 = vld [vmem:[%s2275_s17 + $0x18] sm:$0xff] }
  0x56   : > { %1764 = vmatmul.mubr.msk.f32.vlgmr.msra.gmra.mrb[0].mxu1 %vm464_vm2, %v453_v18  ;;  %1767 = vmatpush3.xpose.msk.msra.mxu0 %vm464_vm2, %v458_v19 }
  0x57   : > { %1768 = vmatprep.mubr.msk.f32.mxu0 %vm2086_vm3, %v2085_v16  ;;  %1772 = vmatpush3.xpose.msk.msra.mxu1 %vm464_vm2, %v459_v20 }
  0x58   : > { %1773 = vmatprep.mubr.msk.f32.mxu1 %vm2086_vm3, %v2085_v16  ;;  %1776 = vmatprep.subr.mxu0 %v2085_v16 }
  0x59   : > { %1769 = vmatmul.mubr.msk.f32.vlgmr.msra.gmra.mrb[2].mxu0 %vm464_vm2, %v454_v21  ;;  %1781 = vmatprep.subr.mxu1 %v2085_v16  ;;  %v833_v21 = vld [vmem:[#allocation3] sm:$0xff] }
  0x5a   : > { %1774 = vmatmul.mubr.msk.f32.vlgmr.msra.gmra.mrb[2].mxu1 %vm464_vm2, %v455_v22  ;;  %1778 = vmatprep.mubr.msk.f32.mxu0 %vm2086_vm3, %v2085_v16 }
  0x5b   : > { %1783 = vmatprep.mubr.msk.f32.mxu1 %vm2086_vm3, %v2085_v16  ;;  %1928 = vset.pattern.permute.xlu1 %v2087_v35 }
  0x5c   : > { %1777 = vmatpush3.msra.mxu0 %v460_v53  ;;  %1782 = vmatpush3.msra.mxu1 %v461_v55 }
  0x5d   : > { %1786 = vmatprep.subr.mxu0 %v2085_v16  ;;  %1791 = vmatprep.subr.mxu1 %v2085_v16 }
 0x128   : > { %v537_v23 = vpop.f32.mrb[0].mxu0 }
 0x129   : > { %v1760_v24 = vpop.f32.mrb[1].mxu0  ;;  %v773_v25 = vsel %vm464_vm2, %v537_v23, -inf  ;;  %v613_v26 = vpop.f32.mrb[0].mxu1 }
 0x12a   : > { %774 = vmax.xlane.f32.xlu0 %v773_v25  ;;  %v1765_v27 = vpop.f32.mrb[1].mxu1  ;;  %v776_v28 = vsel %vm464_vm2, %v613_v26, -inf  ;;  %v834_v24 = vld [vmem:[#allocation3 + $0x8] sm:$0xff] }
 0x12c   : > { %v689_v29 = vpop.f32.mrb[2].mxu0 }
 0x12d   : > { %v1770_v30 = vpop.f32.mrb[3].mxu0  ;;  %v779_v31 = vsel %vm464_vm2, %v689_v29, -inf  ;;  %v765_v32 = vpop.f32.mrb[2].mxu1 }
 0x12e   : > { %777 = vmax.xlane.f32.xlu0 %v776_v28  ;;  %780 = vmax.xlane.f32.xlu1 %v779_v31  ;;  %v1775_v33 = vpop.f32.mrb[3].mxu1  ;;  %v782_v34 = vsel %vm464_vm2, %v765_v32, -inf  ;;  %v835_v30 = vld [vmem:[#allocation3 + $0x10] sm:$0xff] }
 0x12f   : > { %v836_v33 = vld [vmem:[#allocation3 + $0x18] sm:$0xff] }
 0x132   : > { %783 = vmax.xlane.f32.xlu1 %v782_v34 }
 0x1b7   : > { %v775_v37 = vpop.xlane.xlu0 %774 }
 0x1b8   : > { %v785_v38 = vmax.f32 %v769_v36, %v775_v37 }
 0x1ba   : > { %v789_v41 = vsub.f32 %v769_v36, %v785_v38  ;;  %1190 = vst.msk [vmem:[#allocation2] sm:$0xff] %vm857_vm4, %v785_v38  ;;  %803 = vperm.xlu0 %1927, %v785_v38   ;;  %v862_v38 = vld [vmem:[#allocation4] sm:$0xff] }
 0x1bb   : > { %v778_v42 = vpop.xlane.xlu0 %777  ;;  %v781_v43 = vpop.xlane.xlu1 %780 }
 0x1bc   : > { %v793_v44 = vmul.f32 1.442695, %v789_v41  ;;  %v786_v45 = vmax.f32 %v2318_v39, %v778_v42  ;;  %v787_v46 = vmax.f32 %v771_v40, %v781_v43 }
 0x1be   : > { %1929 = vpow2.f32 %v793_v44  ;;  %v790_v48 = vsub.f32 %v2318_v39, %v786_v45  ;;  %1191 = vst.msk [vmem:[#allocation2 + $0x8] sm:$0xff] %vm857_vm4, %v786_v45  ;;  %808 = vperm.xlu1 %1928, %v786_v45   ;;  %v791_v49 = vsub.f32 %v771_v40, %v787_v46  ;;  %1192 = vst.msk [vmem:[#allocation2 + $0x10] sm:$0xff] %vm857_vm4, %v787_v46  ;;  %v863_v40 = vld [vmem:[#allocation4 + $0x8] sm:$0xff] }
 0x1bf   : > { %v784_v50 = vpop.xlane.xlu1 %783 }
 0x1c0   : > { %v788_v51 = vmax.f32 %v2322_v47, %v784_v50  ;;  %v797_v9 = vmul.f32 1.442695, %v791_v49  ;;  %v795_v13 = vmul.f32 1.442695, %v790_v48 }
 0x1c2   : > { %813 = vperm.xlu1 %1928, %v787_v46   ;;  %v792_v52 = vsub.f32 %v2322_v47, %v788_v51  ;;  %1193 = vst.msk [vmem:[#allocation2 + $0x18] sm:$0xff] %vm857_vm4, %v788_v51  ;;  %v864_v46 = vld [vmem:[#allocation4 + $0x10] sm:$0xff] }
 0x1c6   : > { %818 = vperm.xlu1 %1928, %v788_v51   ;;  %v865_v51 = vld [vmem:[#allocation4 + $0x18] sm:$0xff] }
 0x1c8   : > { %v1930_v54 = vpop.eup %1929 }
 0x1c9   : > { %v837_v22 = vmul.f32 %v1930_v54, %v833_v21 }
 0x1ca   : > { %868 = vperm.xlu1 %1928, %v1930_v54  }
 0x239   : > { %v804_v56 = vpop.permute.xlu0 %803 }
 0x23a   : > { %v821_v57 = vsub.f32 %v537_v23, %v804_v56 }
 0x23c   : > { %v825_v58 = vmul.f32 1.442695, %v821_v57 }
 0x23d   : > { %v809_v59 = vpop.permute.xlu1 %808 }
 0x23e   : > { %1931 = vpow2.f32 %v825_v58  ;;  %v822_v60 = vsub.f32 %v613_v26, %v809_v59 }
 0x240   : > { %v827_v61 = vmul.f32 1.442695, %v822_v60 }
 0x241   : > { %v814_v62 = vpop.permute.xlu1 %813 }
 0x242   : > { %1933 = vpow2.f32 %v827_v61  ;;  %v823_v63 = vsub.f32 %v689_v29, %v814_v62 }
 0x244   : > { %v829_v0 = vmul.f32 1.442695, %v823_v63  ;;  %v2088_v63 = vmov (!%p1718_p6), 0  }
 0x245   : > { %v819_v1 = vpop.permute.xlu1 %818 }
 0x246   : > { %1935 = vpow2.f32 %v829_v0  ;;  %v824_v2 = vsub.f32 %v765_v32, %v819_v1 }
 0x248   : > { %v1932_v4 = vpop.eup %1931  ;;  %v831_v5 = vmul.f32 1.442695, %v824_v2 }
 0x249   : > { %1779 = vmatmul.mubr.msk.f32.vlgmr.msra.gmra.mrb[4].mxu0 %vm464_vm2, %v1932_v4  ;;  %v841_v6 = vsel %vm464_vm2, %v1932_v4, 0.0  ;;  %v869_v20 = vpop.permute.xlu1 %868  ;;  %v2089_v4 = vmov (!%p1718_p6), 0.0  }
 0x24a   : > { %1937 = vpow2.f32 %v831_v5  ;;  %842 = vadd.xlane.f32.xlu1 %v841_v6  ;;  %1787 = vmatpush3.msra.mxu0 %v462_v3  ;;  %v886_v39 = vmul.f32 %v869_v20, %v862_v38  ;;  %v1719_v5 = vld [vmem:[%s2449_s3 + $0x8] sm:$0xff] (!%p1718_p6) }
 0x24b   : > { %1788 = vmatprep.mubr.msk.f32.mxu0 %vm2086_vm3, %v2085_v16  ;;  %1939 = vpow2.f32 %v797_v9  ;;  %1796 = vmatprep.subr.mxu0 (!%p1718_p6), %v2089_v4 }
 0x24c   : > { %v1934_v8 = vpop.eup %1933  ;;  %1941 = vpow2.f32 %v795_v13  ;;  %v1722_v13 = vld [vmem:[%s2449_s3 + $0x10] sm:$0xff] (!%p1718_p6) }
 0x24d   : > { %1784 = vmatmul.mubr.msk.f32.vlgmr.msra.gmra.mrb[4].mxu1 %vm464_vm2, %v1934_v8  ;;  %v844_v10 = vsel %vm464_vm2, %v1934_v8, 0.0 }
 0x24e   : > { %845 = vadd.xlane.f32.xlu0 %v844_v10  ;;  %1792 = vmatpush3.msra.mxu1 %v463_v7  ;;  %v1234_v7 = vld [vmem:[%s2449_s3] sm:$0xff] (!%p1718_p6) }
 0x24f   : > { %1793 = vmatprep.mubr.msk.f32.mxu1 %vm2086_vm3, %v2085_v16  ;;  %v799_v16 = vmul.f32 1.442695, %v792_v52  ;;  %1801 = vmatprep.subr.mxu1 (!%p1718_p6), %v2089_v4 }
 0x250   : > { %v1936_v11 = vpop.eup %1935 }
 0x251   : > { %1789 = vmatmul.mubr.msk.f32.vlgmr.msra.gmra.mrb[6].mxu0 %vm464_vm2, %v1936_v11  ;;  %v847_v17 = vsel %vm464_vm2, %v1936_v11, 0.0  ;;  %1943 = vpow2.f32 %v799_v16  ;;  %v1724_v16 = vld [vmem:[%s2449_s3 + $0x18] sm:$0xff] (!%p1718_p6) }
 0x252   : > { %1797 = vmatpush3.msra.mxu0 (!%p1718_p6), %v1719_v5  ;;  %1798 = vmatprep.mubr.msk.f32.mxu0 (!%p1718_p6), %vm2090_vm5, %v2089_v4 }
 0x253   : > { %1806 = vmatprep.subr.mxu0 (!%p1718_p6), %v2089_v4 }
 0x254   : > { %v1938_v12 = vpop.eup %1937 }
 0x255   : > { %1794 = vmatmul.mubr.msk.f32.vlgmr.msra.gmra.mrb[6].mxu1 %vm464_vm2, %v1938_v12  ;;  %v1940_v14 = vpop.eup %1939  ;;  %v850_v18 = vsel %vm464_vm2, %v1938_v12, 0.0 }
 0x256   : > { %v1942_v15 = vpop.eup %1941  ;;  %v839_v31 = vmul.f32 %v1940_v14, %v835_v30  ;;  %1803 = vmatprep.mubr.msk.f32.mxu1 (!%p1718_p6), %vm2090_vm5, %v2089_v4  ;;  %1802 = vmatpush3.msra.mxu1 (!%p1718_p6), %v1234_v7 }
 0x257   : > { %v838_v26 = vmul.f32 %v1942_v15, %v834_v24  ;;  %1811 = vmatprep.subr.mxu1 (!%p1718_p6), %v2089_v4 }
 0x25b   : > { %878 = vperm.xlu1 %1928, %v1940_v14   ;;  %v1944_v19 = vpop.eup %1943 }
 0x25c   : > { %v840_v35 = vmul.f32 %v1944_v19, %v836_v33 }
 0x264   : > { %873 = vperm.xlu0 %1927, %v1942_v15  }
 0x268   : > { %1945 = vset.pattern.permute.xlu0 (!%p1718_p6), %v2088_v63 }
 0x27f   : > { %848 = vadd.xlane.f32.xlu1 %v847_v17 }
 0x283   : > { %851 = vadd.xlane.f32.xlu1 %v850_v18 }
 0x294   : > { %883 = vperm.xlu1 %1928, %v1944_v19  }
 0x298   : > { %1946 = vset.pattern.permute.xlu1 (!%p1718_p6), %v2088_v63 }
 0x2d7   : > { %v843_v23 = vpop.xlane.xlu1 %842 }
 0x2d8   : > { %v853_v25 = vadd.f32 %v843_v23, %v837_v22 }
 0x2da   : > { %858 = vst.msk [vmem:[#allocation3] sm:$0xff] %vm857_vm4, %v853_v25 }
 0x2db   : > { %v846_v27 = vpop.xlane.xlu0 %845  ;;  %v879_v29 = vpop.permute.xlu1 %878 }
 0x2dc   : > { %v854_v28 = vadd.f32 %v846_v27, %v838_v26  ;;  %v888_v50 = vmul.f32 %v879_v29, %v864_v46 }
 0x2de   : > { %859 = vst.msk [vmem:[#allocation3 + $0x8] sm:$0xff] %vm857_vm4, %v854_v28 }
 0x2e1   : > { %v1198_v0 = vld [vmem:[#allocation3] sm:$0xff] (!%p1718_p6) }
 0x2e3   : > { %v874_v41 = vpop.permute.xlu0 %873 }
 0x2e4   : > { %v887_v45 = vmul.f32 %v874_v41, %v863_v40 }
 0x2e5   : > { %v1199_v61 = vld [vmem:[#allocation3 + $0x8] sm:$0xff] (!%p1718_p6) }
 0x30c   : > { %v849_v32 = vpop.xlane.xlu1 %848 }
 0x30d   : > { %v855_v34 = vadd.f32 %v849_v32, %v839_v31  ;;  %v1726_v31 = vld [vmem:[%s2450_s4] ss:$0 sm:$0xff] (!%p1718_p6) }
 0x30f   : > { %860 = vst.msk [vmem:[#allocation3 + $0x10] sm:$0xff] %vm857_vm4, %v855_v34 }
 0x310   : > { %v852_v36 = vpop.xlane.xlu1 %851 }
 0x311   : > { %v856_v37 = vadd.f32 %v852_v36, %v840_v35 }
 0x313   : > { %861 = vst.msk [vmem:[#allocation3 + $0x18] sm:$0xff] %vm857_vm4, %v856_v37 }
 0x314   : > { %v884_v52 = vpop.permute.xlu1 %883 }
 0x315   : > { %v889_v56 = vmul.f32 %v884_v52, %v865_v51 }
 0x316   : > { %v1200_v60 = vld [vmem:[#allocation3 + $0x10] sm:$0xff] (!%p1718_p6) }
 0x317   : > { %1947 = vrcp.f32 (!%p1718_p6), %v1200_v60 }
 0x318   : > { %1949 = vrcp.f32 (!%p1718_p6), %v1199_v61 }
 0x31a   : > { %v1201_v62 = vld [vmem:[#allocation3 + $0x18] sm:$0xff] (!%p1718_p6) }
 0x31b   : > { %1951 = vrcp.f32 (!%p1718_p6), %v1201_v62 }
 0x31c   : > { %v959_v42 = vpop.f32.mrb[4].mxu0  ;;  %1953 = vrcp.f32 (!%p1718_p6), %v1198_v0 }
 0x31d   : > { %v1182_v43 = vadd.f32 %v959_v42, %v886_v39  ;;  %v1780_v44 = vpop.f32.mrb[5].mxu0 }
 0x31f   : > { %1186 = vst.msk [vmem:[#allocation4] sm:$0xff] %vm464_vm2, %v1182_v43 }
 0x320   : > { %v1032_v47 = vpop.f32.mrb[4].mxu1 }
 0x321   : > { %v1183_v48 = vadd.f32 %v1032_v47, %v887_v45  ;;  %v1785_v49 = vpop.f32.mrb[5].mxu1  ;;  %v1948_v1 = vpop.eup (!%p1718_p6), %1947 }
 0x322   : > { %v1950_v2 = vpop.eup (!%p1718_p6), %1949  ;;  %1222 = vperm.xlu1 (!%p1718_p6), %1946, %v1948_v1  }
 0x323   : > { %1187 = vst.msk [vmem:[#allocation4 + $0x8] sm:$0xff] %vm464_vm2, %v1183_v48  ;;  %1217 = vperm.xlu0 (!%p1718_p6), %1945, %v1950_v2  }
 0x324   : > { %v1105_v53 = vpop.f32.mrb[6].mxu0 }
 0x325   : > { %v1184_v54 = vadd.f32 %v1105_v53, %v888_v50  ;;  %v1790_v55 = vpop.f32.mrb[7].mxu0  ;;  %1197 = sbr.rel (%p1718_p6) target bundleno = 1158 (0x486), region = 162  ;;  %v1952_v3 = vpop.eup (!%p1718_p6), %1951 }
 0x326   : > { %v1954_v6 = vpop.eup (!%p1718_p6), %1953  ;;  %1227 = vperm.xlu1 (!%p1718_p6), %1946, %v1952_v3   ;;  %v1206_v14 = vld [vmem:[#allocation4] sm:$0xff] (!%p1718_p6) }
 0x327   : > { %1188 = vst.msk [vmem:[#allocation4 + $0x10] sm:$0xff] %vm464_vm2, %v1184_v54  ;;  %1212 = vperm.xlu0 (!%p1718_p6), %1945, %v1954_v6  }
 0x328   : > { %v1178_v57 = vpop.f32.mrb[6].mxu1 }
 0x329   : > { %v1185_v58 = vadd.f32 %v1178_v57, %v889_v56  ;;  %v1795_v59 = vpop.f32.mrb[7].mxu1 }
 0x32a   : > { %v1207_v8 = vld [vmem:[#allocation4 + $0x8] sm:$0xff] (!%p1718_p6) }
 0x32b   : > { %1189 = vst.msk [vmem:[#allocation4 + $0x18] sm:$0xff] %vm464_vm2, %v1185_v58 }
 0x32e   : > { %v1208_v9 = vld [vmem:[#allocation4 + $0x10] sm:$0xff] }
 0x332   : > { %v1209_v19 = vld [vmem:[#allocation4 + $0x18] sm:$0xff] }
 0x3a1   : > { %v1223_v10 = vpop.permute.xlu1 %1222 }
 0x3a2   : > { %v1218_v11 = vpop.permute.xlu0 %1217  ;;  %v1232_v15 = vmul.f32 %v1223_v10, %v1208_v9 }
 0x3a3   : > { %v1231_v12 = vmul.f32 %v1218_v11, %v1207_v8 }
 0x3a5   : > { %1799 = vmatmul.mubr.msk.f32.vlgmr.msra.gmra.mrb[0].mxu0 %vm464_vm2, %v1231_v12  ;;  %v1228_v20 = vpop.permute.xlu1 %1227 }
 0x3a6   : > { %v1213_v17 = vpop.permute.xlu0 %1212  ;;  %1807 = vmatpush3.msra.mxu0 %v1722_v13  ;;  %1808 = vmatprep.mubr.msk.f32.mxu0 %vm2090_vm5, %v2089_v4  ;;  %v1233_v21 = vmul.f32 %v1228_v20, %v1209_v19 }
 0x3a7   : > { %v1230_v18 = vmul.f32 %v1213_v17, %v1206_v14 }
 0x3a9   : > { %1804 = vmatmul.mubr.msk.f32.vlgmr.msra.gmra.mrb[0].mxu1 %vm464_vm2, %v1230_v18  ;;  %1809 = vmatmul.mubr.msk.f32.vlgmr.msra.gmra.mrb[2].mxu0 %vm464_vm2, %v1232_v15 }
 0x3aa   : > { %1812 = vmatpush3.msra.mxu1 %v1724_v16  ;;  %1813 = vmatprep.mubr.msk.f32.mxu1 %vm2090_vm5, %v2089_v4 }
 0x3ad   : > { %1814 = vmatmul.mubr.msk.f32.vlgmr.msra.gmra.mrb[2].mxu1 %vm464_vm2, %v1233_v21 }
 0x478   : > { %v1306_v22 = vpop.f32.mrb[0].mxu0 }
 0x479   : > { %v1800_v23 = vpop.f32.mrb[1].mxu0 }
 0x47c   : > { %v1379_v24 = vpop.f32.mrb[0].mxu1  ;;  %v1454_v25 = vpop.f32.mrb[2].mxu0 }
 0x47d   : > { %v1380_v26 = vadd.f32 %v1379_v24, %v1306_v22  ;;  %v1805_v27 = vpop.f32.mrb[1].mxu1  ;;  %v1810_v28 = vpop.f32.mrb[3].mxu0 }
 0x47f   : > { %v1458_v29 = vadd.f32 %v1454_v25, %v1380_v26 }
 0x480   : > { %v1530_v30 = vpop.f32.mrb[2].mxu1 }
 0x481   : > { %v1534_v32 = vadd.f32 %v1530_v30, %v1458_v29  ;;  %v1815_v33 = vpop.f32.mrb[3].mxu1 }
 0x483   : > { %v1542_v34 = vadd.f32 %v1726_v31, %v1534_v32 }
 0x485   : > { %1544 = vst.msk [vmem:[%s2277_s13] sm:$0xff] %vm1543_vm6, %v1542_v34 }
 0x486 PF: > { %s1728_s12 = sshll.u32 %s2065_s25, 1  ;;  %s1561_s19 = sshll.u32 %s2277_s13, 4  ;;  %s2384_s19 = int_to_ptr.vmem [resolvable:$true] %s1561_s19 }
 0x487   : > { %s1557_s17 = sadd.s32 %s2061_s24, %s1728_s12  ;;  %s2468_s7 = sld [smem:[#allocation16_spill]] }
 0x488   : > { %s1729_s23 = sshll.u32 %s1557_s17, 7  ;;  %s1546_s5 = scalar_lea.sflag [#allocation9], %s2266_s14 }
 0x489   : > { %s1955_s10 = scalar_lea.vmem %s2384_s19, 128  ;;  %s2091_s8 = smov [#allocation8]  }
 0x48a   : > { %p1956_p7 = scmp.ne.s32.totalorder %s2384_s19, %s1955_s10  ;;  %s1959_s25 = sshll.u32 %s2091_s8, 4  ;;  %s1960_s25 = int_to_ptr.vmem [resolvable:$false] %s1959_s25 }
 0x48b   : > { %s1961_s24 = scalar_lea.vmem %s1960_s25, 256  ;;  %p1962_p10 = scmp.lt.s32.totalorder %s2384_s19, %s1960_s25 }
 0x48c   : > { %p1957_p8 = pnand %p1956_p7, %p2221_p11  ;;  %p1963_p13 = scmp.lt.s32.totalorder %s1961_s24, %s1955_s10 }
 0x48d   : > { %s1559_s18 = scalar_lea.hbm %s2468_s7, %s1729_s23 }
 0x48e   : > { %p1958_p9 = pneg %p1957_p8  ;;  %p1964_p0 = por %p1963_p13, %p1962_p10 }
 0x490   : > { %p1965_p2 = pnand %p1964_p0, %p1958_p9 }
 0x492   : > { %1968 = shalt.err (!%p1965_p2)
}
 0x493   : > { %s1969_s13 = scalar_lea.hbm %s1559_s18, 128  ;;  %s1973_s12 = scalar_lea.hbm %s2468_s7, 512 }
 0x494   : > { %p1970_p1 = scmp.ne.s32.totalorder %s1559_s18, %s1969_s13  ;;  %p1974_p5 = scmp.lt.u32.totalorder %s1559_s18, %s2468_s7 }
 0x495   : > { %p1975_p6 = scmp.lt.u32.totalorder %s1973_s12, %s1969_s13  ;;  %p1977_p8 = scmp.lt.u32.totalorder %s1969_s13, %s1559_s18 }
 0x496   : > { %p1971_p3 = pnand %p1970_p1, %p2221_p11 }
 0x497   : > { %p1976_p7 = por %p1975_p6, %p1974_p5 }
 0x498   : > { %p1972_p4 = pneg %p1971_p3 }
 0x499   : > { %p1978_p10 = por %p1977_p8, %p1976_p7 }
 0x49b   : > { %p1979_p9 = pnand %p1978_p10, %p1972_p4 }
 0x49d   : > { %1982 = shalt.err (!%p1979_p9)
}
 0x49e   : > { %1816 = dma.vmem_to_hbm [thread:$0]  (%p2221_p11), %s2384_s19, 128, %s1559_s18, %s1546_s5  }
 0x49f PF: > { %s2469_s11 = sld [smem:[#allocation11_spill]]  ;;  %p1822_p13 = scmp.ge.s32.totalorder %s2081_s29, 2 }
 0x4a1   : > { %p1819_p0 = pnand %p1822_p13, %p2225_p12 }
 0x4a5   : > { %s1573_s10 = sand.u32 1, %s2469_s11  }
 0x4a6   : > { %s1574_s8 = scalar_lea.sflag [#allocation9], %s1573_s10 }
 0x4a7   : > { %2032 = dma.done.wait (!%p1819_p0), %s1574_s8, 128  }
 0x4a8   : > { %2034 = vsyncadd (!%p1819_p0), %s1574_s8, 4294967168  ;;  %s18_s29 = sadd.s32 1, %s2081_s29   ;;  %s2471_s15 = sld [smem:[#allocation12_spill]] }
 0x4a9   : > { %p15_p2 = scmp.ge.s32.totalorder %s18_s29, 10   ;;  %s2472_s5 = sld [smem:[#allocation13_spill]] }
 0x4aa   : > { %s2473_s13 = sld [smem:[#allocation14_spill]]  ;;  %s2474_s18 = smov %s2049_s21 }
 0x4ab   : > { %s2475_s19 = smov %s2045_s20  ;;  %s2476_s20 = smov %s2236_s6 }
 0x4ac   : > { %s2477_s21 = smov %s2053_s22  ;;  %s2478_s22 = smov %s2233_s30 }
 0x4ad   : > { %s2479_s23 = smov %s2069_s26  ;;  %s2480_s24 = smov %s2073_s27 }
 0x4ae   : > { %s2481_s25 = smov %s2077_s28  ;;  %s2482_s26 = smov %s2471_s15 }
 0x4af   : > { %s2483_s27 = smov %s2472_s5  ;;  %17 = sbr.rel (!%p15_p2) target bundleno = 9 (0x9), region = 221 }
 0x4b0   : > { %s2484_s28 = smov %s2473_s13 }
 0x4b6   :  { %1579 = vsyncpa [#allocation9], 1 }
 0x4b7   :  { %1581 = vsyncpa [#allocation9 + $0x1], 1 }

</bundles_post_ra>
